<compile_context>
chip_gen: v6e
topology: v6e:2x2x1
jax: 0.10.0
libtpu: 0.0.40
codegen_flags: <defaults>
</compile_context>

<pallas_src>
import jax
import jax.numpy as jnp
from jax.experimental import pallas as pl
from jax.experimental.pallas import tpu as pltpu

hidden_size = 16
input_size = 9
output_size = 4


def _round_up(x, m):
    return ((x + m - 1) // m) * m


def mlp_kernel(xt_ref, w1_ref, b1_ref, w2_ref, b2_ref, o_ref):
    xt = xt_ref[...]                                               # (input, TILE_B)
    # fc1 + ReLU: (hidden, input) @ (input, TILE_B) -> (hidden, TILE_B)
    h = jnp.dot(w1_ref[...], xt, preferred_element_type=jnp.float32) + b1_ref[...]
    h = jnp.maximum(h, 0.0)
    # fc2: (out, hidden) @ (hidden, TILE_B) -> (out, TILE_B)
    logits = jnp.dot(w2_ref[...], h, preferred_element_type=jnp.float32) + b2_ref[...]
    # Numerically stable softmax over the feature (sublane) axis.
    m = jnp.max(logits, axis=0, keepdims=True)
    e = jnp.exp(logits - m)
    denom = jnp.sum(e, axis=0, keepdims=True)
    # EUP approx reciprocal + one Newton step: off the VALU path, ~1e-6 rel err.
    inv = pl.reciprocal(denom, approx=True)
    inv = inv * (2.0 - denom * inv)
    o_ref[...] = (e * inv).astype(o_ref.dtype)


def simple_mlp_t(xt, w1, b1, w2, b2, *, tile_b=65536):
    """Feature-major entry point (no wrapper-side copies).

    xt: (input_size, B) f32 — batch on the lane axis.
    w1: (hidden, input), b1: (hidden,), w2: (out, hidden), b2: (out,)
    Returns (output_size, B) softmax probabilities.
    """
    B = xt.shape[1]
    b1c = jnp.reshape(b1, (hidden_size, 1)).astype(jnp.float32)
    b2c = jnp.reshape(b2, (output_size, 1)).astype(jnp.float32)

    # --- tile sizing (static Python ints) ---------------------------------
    bp = _round_up(B, 128)
    tile_b = max(128, _round_up(int(tile_b), 128))   # lane dim must be a multiple of 128
    tile_b = min(tile_b, 262144)                     # beyond ~256K lanes gains are <4%
    tile_b = min(tile_b, bp)                         # never bigger than the (padded) batch
    if bp >= 256:
        # Keep >= 2 grid steps so the "parallel" batch axis can shard over v7x's 2 TCs.
        tile_b = min(tile_b, _round_up(pl.cdiv(B, 2), 128))
    grid = (pl.cdiv(B, tile_b),)                     # ragged last block handled by Pallas

    # VMEM budget: x tile (9->16 sublanes) + out tile (4->8 sublanes), double-buffered,
    # plus ~4 MiB headroom for resident weights / intermediates.  Cap below v7x's 64 MiB.
    per_lane_bytes = 2 * (16 * 4) + 2 * (8 * 4)      # ~192 B per lane
    vmem_limit = int(min(56 << 20, per_lane_bytes * tile_b + (4 << 20)))

    return pl.pallas_call(
        mlp_kernel,
        out_shape=jax.ShapeDtypeStruct((output_size, B), jnp.float32),
        grid_spec=pltpu.PrefetchScalarGridSpec(
            num_scalar_prefetch=0,
            grid=grid,
            in_specs=[
                pl.BlockSpec((input_size, tile_b), lambda i: (0, i)),        # x^T tile
                pl.BlockSpec((hidden_size, input_size), lambda i: (0, 0)),   # W1 resident
                pl.BlockSpec((hidden_size, 1), lambda i: (0, 0)),            # b1 resident
                pl.BlockSpec((output_size, hidden_size), lambda i: (0, 0)),  # W2 resident
                pl.BlockSpec((output_size, 1), lambda i: (0, 0)),            # b2 resident
            ],
            out_specs=pl.BlockSpec((output_size, tile_b), lambda i: (0, i)),
        ),
        compiler_params=pltpu.CompilerParams(
            dimension_semantics=("parallel",),       # shard batch tiles over v7x's 2 TCs
            vmem_limit_bytes=vmem_limit,
        ),
    )(xt, w1, b1c, w2, b2c)


def simple_mlp(x, w1, b1, w2, b2, *, tile_b=65536):
    """PyTorch-layout wrapper: x (B, input_size) -> (B, output_size).
    Prefer simple_mlp_t (feature-major) to avoid the two transposes on a
    bandwidth-bound op."""
    return simple_mlp_t(x.T, w1, b1, w2, b2, tile_b=tile_b).T


def init_params(key):
    # nn.Linear-style uniform(-1/sqrt(fan_in), 1/sqrt(fan_in)), (out, in) layout.
    k1, k2, k3, k4 = jax.random.split(key, 4)
    bound1 = 1.0 / (input_size ** 0.5)
    bound2 = 1.0 / (hidden_size ** 0.5)
    w1 = jax.random.uniform(k1, (hidden_size, input_size), jnp.float32, -bound1, bound1)
    b1 = jax.random.uniform(k2, (hidden_size,), jnp.float32, -bound1, bound1)
    w2 = jax.random.uniform(k3, (output_size, hidden_size), jnp.float32, -bound2, bound2)
    b2 = jax.random.uniform(k4, (output_size,), jnp.float32, -bound2, bound2)
    return w1, b1, w2, b2


def reference_mlp(x, w1, b1, w2, b2):
    h = jnp.maximum(x @ w1.T + b1[None, :], 0.0)
    return jax.nn.softmax(h @ w2.T + b2[None, :], axis=-1)


if __name__ == "__main__":
    key = jax.random.PRNGKey(0)
    kx_small, kx_big, kp = jax.random.split(key, 3)
    w1, b1, w2, b2 = init_params(kp)

    # Small batch (exercises the ragged single block) and a larger batch
    # (exercises the multi-step grid + 2-TC tile cap + partial last block).
    for bsz, kk in ((8, kx_small), (1000, kx_big)):
        x = jax.random.normal(kk, (bsz, input_size), jnp.float32)
        ref = reference_mlp(x, w1, b1, w2, b2)

        # Batch-major (PyTorch) contract.
        out = jax.block_until_ready(simple_mlp(x, w1, b1, w2, b2))
        assert out.shape == (bsz, output_size)
        assert jnp.allclose(out, ref, atol=1e-4, rtol=1e-4)
        assert jnp.allclose(jnp.sum(out, axis=-1), 1.0, atol=1e-4)

        # Feature-major contract (no wrapper transposes).
        out_t = jax.block_until_ready(simple_mlp_t(x.T, w1, b1, w2, b2))
        assert out_t.shape == (output_size, bsz)
        assert jnp.allclose(out_t.T, ref, atol=1e-4, rtol=1e-4)

    print("KERNEL_OK")
</pallas_src>

<mosaic_0001>
module attributes {stable_mosaic.version = 11 : i64} {
  func.func @mlp_kernel(%arg0: i32, %arg1: memref<9x128xf32, #tpu.memory_space<vmem>>, %arg2: memref<16x9xf32, #tpu.memory_space<vmem>>, %arg3: memref<16x1xf32, #tpu.memory_space<vmem>>, %arg4: memref<4x16xf32, #tpu.memory_space<vmem>>, %arg5: memref<4x1xf32, #tpu.memory_space<vmem>>, %arg6: memref<4x128xf32, #tpu.memory_space<vmem>>) attributes {dimension_semantics = [#tpu.dimension_semantics<parallel>], iteration_bounds = array<i64: 1>, scalar_prefetch = 0 : i64, scratch_operands = 0 : i64, tpu.core_type = #tpu.core_type<tc>, window_params = [{transform_indices = @transform_0, window_bounds = array<i64: 9, 128>}, {pipeline_mode = #tpu.pipeline_mode<synchronous>, transform_indices = @transform_1, window_bounds = array<i64: 16, 9>}, {pipeline_mode = #tpu.pipeline_mode<synchronous>, transform_indices = @transform_2, window_bounds = array<i64: 16, 1>}, {pipeline_mode = #tpu.pipeline_mode<synchronous>, transform_indices = @transform_3, window_bounds = array<i64: 4, 16>}, {pipeline_mode = #tpu.pipeline_mode<synchronous>, transform_indices = @transform_4, window_bounds = array<i64: 4, 1>}, {transform_indices = @transform_5, window_bounds = array<i64: 4, 128>}]} {
    %c0 = arith.constant 0 : index
    %c0_0 = arith.constant 0 : index
    %0 = vector.load %arg1[%c0, %c0_0] : memref<9x128xf32, #tpu.memory_space<vmem>>, vector<9x128xf32>
    %c0_1 = arith.constant 0 : index
    %c0_2 = arith.constant 0 : index
    %1 = vector.load %arg2[%c0_1, %c0_2] : memref<16x9xf32, #tpu.memory_space<vmem>>, vector<16x9xf32>
    %cst = arith.constant dense<0.000000e+00> : vector<16x128xf32>
    %2 = tpu.matmul %1, %0, %cst {dimension_numbers = #tpu.dot_dimension_numbers<[1], [0], [0], [1], [0, 0, 1, 1], [], []>} : vector<16x9xf32>, vector<9x128xf32>, vector<16x128xf32> -> vector<16x128xf32>
    %c0_3 = arith.constant 0 : index
    %c0_4 = arith.constant 0 : index
    %3 = vector.load %arg3[%c0_3, %c0_4] : memref<16x1xf32, #tpu.memory_space<vmem>>, vector<16x1xf32>
    %4 = vector.broadcast %3 : vector<16x1xf32> to vector<16x128xf32>
    %5 = arith.addf %2, %4 : vector<16x128xf32>
    %cst_5 = arith.constant 0.000000e+00 : f32
    %6 = vector.broadcast %cst_5 : f32 to vector<16x128xf32>
    %7 = arith.maximumf %5, %6 : vector<16x128xf32>
    %c0_6 = arith.constant 0 : index
    %c0_7 = arith.constant 0 : index
    %8 = vector.load %arg4[%c0_6, %c0_7] : memref<4x16xf32, #tpu.memory_space<vmem>>, vector<4x16xf32>
    %cst_8 = arith.constant dense<0.000000e+00> : vector<4x128xf32>
    %9 = tpu.matmul %8, %7, %cst_8 {dimension_numbers = #tpu.dot_dimension_numbers<[1], [0], [0], [1], [0, 0, 1, 1], [], []>} : vector<4x16xf32>, vector<16x128xf32>, vector<4x128xf32> -> vector<4x128xf32>
    %c0_9 = arith.constant 0 : index
    %c0_10 = arith.constant 0 : index
    %10 = vector.load %arg5[%c0_9, %c0_10] : memref<4x1xf32, #tpu.memory_space<vmem>>, vector<4x1xf32>
    %11 = vector.broadcast %10 : vector<4x1xf32> to vector<4x128xf32>
    %12 = arith.addf %9, %11 : vector<4x128xf32>
    %cst_11 = arith.constant dense<0xFF800000> : vector<128xf32>
    %13 = vector.multi_reduction <maximumf>, %12, %cst_11 [0] : vector<4x128xf32> to vector<128xf32>
    %14 = vector.shape_cast %13 : vector<128xf32> to vector<1x128xf32>
    %15 = vector.broadcast %14 : vector<1x128xf32> to vector<4x128xf32>
    %16 = arith.subf %12, %15 : vector<4x128xf32>
    %17 = math.exp %16 : vector<4x128xf32>
    %cst_12 = arith.constant dense<0.000000e+00> : vector<128xf32>
    %18 = vector.multi_reduction <add>, %17, %cst_12 [0] : vector<4x128xf32> to vector<128xf32>
    %19 = vector.shape_cast %18 : vector<128xf32> to vector<1x128xf32>
    %20 = tpu.reciprocal %19 {approx = true} : vector<1x128xf32> -> vector<1x128xf32>
    %21 = arith.mulf %19, %20 : vector<1x128xf32>
    %cst_13 = arith.constant 2.000000e+00 : f32
    %22 = vector.broadcast %cst_13 : f32 to vector<1x128xf32>
    %23 = arith.subf %22, %21 : vector<1x128xf32>
    %24 = arith.mulf %20, %23 : vector<1x128xf32>
    %25 = vector.broadcast %24 : vector<1x128xf32> to vector<4x128xf32>
    %26 = arith.mulf %17, %25 : vector<4x128xf32>
    %c0_14 = arith.constant 0 : index
    %c0_15 = arith.constant 0 : index
    %27 = vector.load %arg6[%c0_14, %c0_15] : memref<4x128xf32, #tpu.memory_space<vmem>>, vector<4x128xf32>
    tpu.vector_store %arg6[%c0_14, %c0_15], %26 {strides = array<i32>} : memref<4x128xf32, #tpu.memory_space<vmem>>, vector<4x128xf32>,
    return
  }
  func.func @transform_0(%arg0: i32) -> (i32, i32) {
    %c0_i32 = arith.constant 0 : i32
    %c0_i32_0 = arith.constant 0 : i32
    return %c0_i32, %arg0 : i32, i32
  }
  func.func @transform_1(%arg0: i32) -> (i32, i32) {
    %c0_i32 = arith.constant 0 : i32
    %c0_i32_0 = arith.constant 0 : i32
    %c0_i32_1 = arith.constant 0 : i32
    return %c0_i32, %c0_i32_0 : i32, i32
  }
  func.func @transform_2(%arg0: i32) -> (i32, i32) {
    %c0_i32 = arith.constant 0 : i32
    %c0_i32_0 = arith.constant 0 : i32
    %c0_i32_1 = arith.constant 0 : i32
    return %c0_i32, %c0_i32_0 : i32, i32
  }
  func.func @transform_3(%arg0: i32) -> (i32, i32) {
    %c0_i32 = arith.constant 0 : i32
    %c0_i32_0 = arith.constant 0 : i32
    %c0_i32_1 = arith.constant 0 : i32
    return %c0_i32, %c0_i32_0 : i32, i32
  }
  func.func @transform_4(%arg0: i32) -> (i32, i32) {
    %c0_i32 = arith.constant 0 : i32
    %c0_i32_0 = arith.constant 0 : i32
    %c0_i32_1 = arith.constant 0 : i32
    return %c0_i32, %c0_i32_0 : i32, i32
  }
  func.func @transform_5(%arg0: i32) -> (i32, i32) {
    %c0_i32 = arith.constant 0 : i32
    %c0_i32_0 = arith.constant 0 : i32
    return %c0_i32, %arg0 : i32, i32
  }
}

</mosaic_0001>

<bundles_post_ra>
// kernel: tpu_custom_call.1
= control target key start
LH: loop header
LB: loop body
LE: loop exit
PB: predicated region body
PF: predicated region fallthrough
CT: control target
= control target key end

     0   :  { %vm44_vm0 = vcmask 1040384   ;;  %vm37_vm1 = vcmask 72704   ;;  %v301_v5 = vmov 0   ;;  %s362_s0 = inlined_call_operand.vmem [shape: f32[9,8], index: 0, kind: input, shape index: {}]   ;;  %s363_s1 = inlined_call_operand.vmem [shape: f32[16,9], index: 1, kind: input, shape index: {}]   ;;  %s364_s2 = inlined_call_operand.vmem [shape: f32[16,1], index: 2, kind: input, shape index: {}]   ;;  %s365_s3 = inlined_call_operand.vmem [shape: f32[4,16], index: 3, kind: input, shape index: {}]   ;;  %s366_s4 = inlined_call_operand.vmem [shape: f32[4,1], index: 4, kind: input, shape index: {}]   ;;  %s367_s5 = inlined_call_operand.hbm [shape: f32[4,8], index: 5, kind: output, shape index: {}]  }
   0x1   :  { %v22_v0 = vld [vmem:[%s362_s0 + $0x8] sm:$0x1]  ;;  %v21_v1 = vld [vmem:[%s362_s0] sm:$0xff]  ;;  %273 = vset.pattern.permute.xlu0 %v301_v5 }
   0x2   :  { %v23_v2 = vld [vmem:[%s363_s1] sm:$0xff]  ;;  %255 = vmatprep.subr.msk.mxu0 %vm44_vm0, %v22_v0  ;;  %v26_v3 = vld [vmem:[%s364_s2 + $0x8] sm:$0xff] }
   0x3   :  { %259 = vmatprep.mubr.msk.f32.mxu0 %vm37_vm1, %v23_v2  ;;  %256 = vmatpush3.msk.msra.mxu0 %vm44_vm0, %v22_v0  ;;  %v24_v4 = vld [vmem:[%s363_s1 + $0x8] sm:$0xff] }
   0x4   :  { %10 = vsyncpa [#allocation3], 0  ;;  %257 = vmatprep.subr.mxu0 %v21_v1  ;;  %34 = vperm.xlu0 %273, %v26_v3   ;;  %v25_v6 = vld [vmem:[%s364_s2] sm:$0xff]  ;;  %v302_v7 = vmov 0.0   ;;  %vm303_vm2 = vmmov 0   ;;  %vm132_vm3 = vcmask 130048  }
   0x5   :  { %258 = vmatpush3.msra.mxu0 %v21_v1  ;;  %274 = vset.pattern.permute.xlu1 %v301_v5  ;;  %v126_v8 = vld [vmem:[%s366_s4] sm:$0xf]  ;;  %vm206_vm4 = vcmask 1043456  }
   0x6   :  { %260 = vmatmul.mubr.msk.f32.vlgmr.msra.gmra.mxu0 %vm37_vm1, %v24_v4  ;;  %262 = vmatprep.subr.mxu1 %v302_v7  ;;  %v125_v17 = vld [vmem:[%s365_s3] sm:$0xf]  ;;  %s304_s3 = smov [#allocation2]  }
   0x7   :  { %266 = vmatprep.mubr.msk.f32.mxu1 %vm303_vm2, %v302_v7  ;;  %129 = vperm.xlu1 %274, %v126_v8   ;;  %s236_s4 = sshll.u32 %s304_s3, 4  ;;  %s237_s4 = int_to_ptr.vmem [resolvable:$true] %s236_s4 }
   0x8   :  { %29 = vperm.xlu0 %273, %v25_v6   ;;  %s279_s6 = scalar_lea.vmem %s237_s4, 64  ;;  %p284_p1 = scmp.lt.s32.totalorder %s237_s4, %s237_s4 }
   0x9   :  { %p280_p0 = scmp.ne.s32.totalorder %s237_s4, %s279_s6  ;;  %p285_p2 = scmp.lt.s32.totalorder %s279_s6, %s279_s6 }
   0xb   :  { %p286_p3 = por %p285_p2, %p284_p1 }
   0xd   :  { %p287_p4 = pnand %p286_p3, %p280_p0 }
  0x7f   :  { %v35_v9 = vpop.permute.xlu0 %34 }
  0x82   :  { %v130_v18 = vpop.permute.xlu1 %129 }
  0x83   :  { %v30_v12 = vpop.permute.xlu0 %29 }
  0xc6   :  { %v261_v10 = vpop.f32.mrf.mxu0 }
  0xc7   :  { %v120_v11 = vadd.f32 %v261_v10, %v35_v9 }
  0xc8   :  { %v114_v13 = vpop.f32.mrf.mxu0 }
  0xc9   :  { %v124_v14 = vmax.f32 %v120_v11, 0.0  ;;  %v115_v15 = vadd.f32 %v114_v13, %v30_v12 }
  0xcb   :  { %v123_v16 = vmax.f32 %v115_v15, 0.0  ;;  %263 = vmatpush3.msra.mxu1 %v124_v14 }
  0xcc   :  { %264 = vmatprep.subr.mxu1 %v302_v7 }
  0xcd   :  { %265 = vmatpush3.msra.mxu1 %v123_v16 }
  0xce   :  { %267 = vmatmul.mubr.msk.f32.vlgmr.msra.gmra.mxu1 %vm132_vm3, %v125_v17 }
 0x18e   :  { %v202_v19 = vpop.f32.mrf.mxu1 }
 0x18f   :  { %v203_v20 = vadd.f32 %v202_v19, %v130_v18 }
 0x190   :  { %v268_v21 = vpop.f32.mrf.mxu1 }
 0x191   :  { %v207_v22 = vsel %vm206_vm4, %v203_v20, -inf }
 0x192   :  { %v208_v23 = vrot.slane %v207_v22, 4 }
 0x194   :  { %v209_v24 = vmax.f32 %v207_v22, %v208_v23 }
 0x196   :  { %v210_v25 = vrot.slane %v209_v24, 2 }
 0x198   :  { %v211_v26 = vmax.f32 %v209_v24, %v210_v25 }
 0x19a   :  { %v212_v27 = vrot.slane %v211_v26, 1 }
 0x19c   :  { %v213_v28 = vmax.f32 %v211_v26, %v212_v27 }
 0x19e   :  { %v214_v29 = vsub.f32 %v203_v20, %v213_v28 }
 0x1a0   :  { %v215_v30 = vmul.f32 1.442695, %v214_v29 }
 0x1a2   :  { %275 = vpow2.f32 %v215_v30 }
 0x1af   :  { %v276_v31 = vpop.eup %275 }
 0x1b0   :  { %v217_v32 = vsel %vm206_vm4, %v276_v31, 0.0 }
 0x1b1   :  { %v218_v33 = vrot.slane %v217_v32, 4 }
 0x1b3   :  { %v219_v34 = vadd.f32 %v218_v33, %v217_v32 }
 0x1b5   :  { %v220_v35 = vrot.slane %v219_v34, 2 }
 0x1b7   :  { %v221_v36 = vadd.f32 %v220_v35, %v219_v34 }
 0x1b9   :  { %v222_v37 = vrot.slane %v221_v36, 1 }
 0x1bb   :  { %v223_v38 = vadd.f32 %v222_v37, %v221_v36 }
 0x1bd   :  { %277 = vrcp.f32 %v223_v38 }
 0x1ca   :  { %v278_v39 = vpop.eup %277 }
 0x1cb   :  { %v225_v40 = vmul.f32 %v278_v39, %v223_v38 }
 0x1cd   :  { %v226_v41 = vsub.f32 2.0, %v225_v40 }
 0x1cf   :  { %v227_v42 = vmul.f32 %v278_v39, %v226_v41 }
 0x1d1   :  { %v228_v43 = vmul.f32 %v276_v31, %v227_v42 }
 0x1d3   :  { %229 = vst [vmem:[#allocation2] sm:$0xf] %v228_v43 }
 0x1d4   :  { %290 = shalt.err (!%p287_p4)
}
 0x1d5   :  { %239 = dma.vmem_to_hbm [thread:$0]  %s237_s4, 64, %s367_s5, [#allocation3]  }
 0x1d6   :  { %299 = dma.done.wait [#allocation3], 64  }
 0x1d7   :  { %300 = vsyncadd [#allocation3], 4294967232 }
 0x1d8   :  { %243 = vsyncpa [#allocation3], 1 }

</bundles_post_ra>
